<compile_context>
chip_gen: v6e
topology: v6e:2x2x1
jax: 0.10.0
libtpu: 0.0.40
codegen_flags: <defaults>
</compile_context>

<pallas_src>
import jax
import jax.numpy as jnp
from jax.experimental import pallas as pl
from jax.experimental.pallas import tpu as pltpu


def _som_train_kernel(params_ref, x_ref, w_ref, loc_ref, out_ref):
    """Fused SOM training steps.

    Layout (lane-dense, neurons on the lane axis):
      params_ref : SMEM f32[5]  = [it0, epochs, alpha, sigma, eps]
      x_ref      : (1, D, 1)    current input vector (streamed per grid step)
      w_ref      : (D, G)       initial weights (read once at step 0)
      loc_ref    : (2, G)       neuron grid locations (row 0 = i, row 1 = j), f32
      out_ref    : (D, G)       VMEM-resident weights accumulator (aliased to w)
    """
    step = pl.program_id(0)

    it0 = params_ref[0]
    epochs = params_ref[1]
    alpha = params_ref[2]
    sigma = params_ref[3]
    eps = params_ref[4]

    # Decayed hyper-parameters, derived in-kernel from the step index.
    it = it0 + step.astype(jnp.float32)
    decay = 1.0 - it / epochs
    alpha_op = alpha * decay
    sigma_op = sigma * decay

    # Weights live in the output VMEM block across the whole grid; seed at step 0.
    @pl.when(step == 0)
    def _():
        out_ref[...] = w_ref[...]

    w = out_ref[...]                       # (D, G) current weights
    x_col = x_ref[0]                       # (D, 1), lane-broadcasts against w
    loc = loc_ref[...]                     # (2, G)
    G = w.shape[1]

    # Squared pairwise distance (sqrt dropped: monotone, argmin unchanged).
    d0 = x_col - w                         # (D, G), reused for the update
    de = d0 + eps                          # PairwiseDistance adds eps pre-norm
    dists_sq = jnp.sum(de * de, axis=0, keepdims=True)          # (1, G)

    # argmin over the lane axis (first occurrence, like torch.min).
    lane_idx = jax.lax.broadcasted_iota(jnp.int32, (1, G), 1)   # (1, G)
    min_val = jnp.min(dists_sq)
    bmu_idx = jnp.min(jnp.where(dists_sq == min_val, lane_idx, G))

    # Gather the BMU location with a lane-dense masked reduction.
    bmu_mask = lane_idx == bmu_idx
    bmu_row = jnp.sum(jnp.where(bmu_mask, loc[0:1, :], 0.0))
    bmu_col = jnp.sum(jnp.where(bmu_mask, loc[1:2, :], 0.0))

    # Squared grid distance of every neuron to the BMU (small ints, exact in f32).
    dr = loc[0:1, :] - bmu_row
    dc = loc[1:2, :] - bmu_col
    location_dist = dr * dr + dc * dc                            # (1, G)

    neighbourhood = jnp.exp(-location_dist / (2.0 * sigma_op * sigma_op))
    lr = alpha_op * neighbourhood                                # (1, G)

    out_ref[...] = w + lr * d0             # lr sublane-broadcasts over D


def som_train(xs, weights, locations, it0, epochs, alpha, sigma):
    """Run xs.shape[0] fused SOM updates; step s uses input xs[s] and it = it0 + s.

    xs:        (num_steps, dim) float32
    weights:   (grid_size, dim)
    locations: (grid_size, 2) int
    Returns the updated weights, shape (grid_size, dim) float32.
    """
    num_steps, dim = xs.shape
    grid_size = weights.shape[0]

    # One-time layout / casting work (outside the fused hot loop).
    w_t = jnp.asarray(weights, jnp.float32).T            # (D, G), lane-dense
    loc_t = jnp.asarray(locations, jnp.float32).T        # (2, G), lane-dense
    xs3 = jnp.asarray(xs, jnp.float32).reshape(num_steps, dim, 1)
    params = jnp.array([it0, epochs, alpha, sigma, 1e-6], dtype=jnp.float32)

    out_t = pl.pallas_call(
        _som_train_kernel,
        grid=(num_steps,),
        in_specs=[
            pl.BlockSpec(memory_space=pltpu.MemorySpace.SMEM),        # params (scalars)
            pl.BlockSpec((1, dim, 1), lambda s: (s, 0, 0)),           # x, streamed per step
            pl.BlockSpec((dim, grid_size), lambda s: (0, 0)),         # weights, loaded once
            pl.BlockSpec((2, grid_size), lambda s: (0, 0)),           # locations, loaded once
        ],
        out_specs=pl.BlockSpec((dim, grid_size), lambda s: (0, 0)),   # VMEM-resident accumulator
        out_shape=jax.ShapeDtypeStruct((dim, grid_size), jnp.float32),
        input_output_aliases={2: 0},                                  # weights -> output buffer
        compiler_params=pltpu.CompilerParams(
            dimension_semantics=("arbitrary",)),                      # steps are sequential
    )(params, xs3, w_t, loc_t)

    return out_t.T                                        # back to module's (G, D) layout


def som_forward(x, weights, locations, it, epochs, alpha, sigma):
    """Single SOM step (the module's forward); returns the updated weights."""
    return som_train(x.reshape(1, -1), weights, locations, it, epochs, alpha, sigma)


def som_train_ref(xs, weights, locations, it0, epochs, alpha, sigma):
    """Pure-JAX reference mirroring the PyTorch module exactly, step by step."""
    eps = 1e-6
    w = jnp.asarray(weights, jnp.float32)
    loc = jnp.asarray(locations)
    for s in range(xs.shape[0]):
        x = xs[s]
        it = it0 + s
        dists = jnp.linalg.norm(x[None, :] - w + eps, axis=1)
        bmu_index = jnp.argmin(dists)
        bmu_loc = loc[bmu_index]
        lr_op = 1.0 - it / epochs
        alpha_op = alpha * lr_op
        sigma_op = sigma * lr_op
        location_dist = jnp.sum((loc - bmu_loc) ** 2, axis=1).astype(jnp.float32)
        neigh = jnp.exp(-location_dist / (2.0 * sigma_op ** 2))
        lr = (alpha_op * neigh)[:, None]
        w = w + lr * (x[None, :] - w)
    return w


if __name__ == "__main__":
    # SOM hyper-params (small, consistent with the module's __init__).
    m, n, dim, epochs = 8, 16, 32, 100
    alpha = 0.3
    sigma = max(m, n) / 2.0
    it0 = 3
    num_steps = 32

    key = jax.random.PRNGKey(0)
    k_w, k_x = jax.random.split(key)
    weights = jax.random.normal(k_w, (m * n, dim), dtype=jnp.float32)   # torch.randn(m*n, dim)
    xs = jax.random.normal(k_x, (num_steps, dim), dtype=jnp.float32)    # one input per step
    locations = jnp.array([[i, j] for i in range(m) for j in range(n)], dtype=jnp.int32)

    # Fused multi-step training run (single pallas_call).
    new_w = som_train(xs, weights, locations, it0, epochs, alpha, sigma)
    new_w = jax.block_until_ready(new_w)

    ref_w = som_train_ref(xs, weights, locations, it0, epochs, alpha, sigma)
    assert new_w.shape == (m * n, dim)
    assert jnp.allclose(new_w, ref_w, atol=1e-4, rtol=1e-4), "mismatch vs reference (multi-step)"

    # Single-step parity check (the module's forward).
    one_w = jax.block_until_ready(
        som_forward(xs[0], weights, locations, it0, epochs, alpha, sigma))
    one_ref = som_train_ref(xs[:1], weights, locations, it0, epochs, alpha, sigma)
    assert jnp.allclose(one_w, one_ref, atol=1e-5, rtol=1e-5), "mismatch vs reference (1 step)"

    print("KERNEL_OK")
</pallas_src>

<mosaic_0001>
module attributes {stable_mosaic.version = 11 : i64} {
  func.func @_som_train_kernel(%arg0: i32, %arg1: memref<5xf32, #tpu.memory_space<smem>>, %arg2: memref<1x32x1xf32, #tpu.memory_space<vmem>>, %arg3: memref<32x128xf32, #tpu.memory_space<vmem>>, %arg4: memref<2x128xf32, #tpu.memory_space<vmem>>, %arg5: memref<32x128xf32, #tpu.memory_space<vmem>>) attributes {dimension_semantics = [#tpu.dimension_semantics<arbitrary>], iteration_bounds = array<i64: 32>, scalar_prefetch = 0 : i64, scratch_operands = 0 : i64, tpu.core_type = #tpu.core_type<tc>, window_params = [{transform_indices = @transform_0, window_bounds = array<i64: 5>}, {transform_indices = @transform_1, window_bounds = array<i64: 1, 32, 1>}, {pipeline_mode = #tpu.pipeline_mode<synchronous>, transform_indices = @transform_2, window_bounds = array<i64: 32, 128>}, {pipeline_mode = #tpu.pipeline_mode<synchronous>, transform_indices = @transform_3, window_bounds = array<i64: 2, 128>}, {pipeline_mode = #tpu.pipeline_mode<synchronous>, transform_indices = @transform_4, window_bounds = array<i64: 32, 128>}]} {
    %c0 = arith.constant 0 : index
    %0 = memref.load %arg1[%c0] : memref<5xf32, #tpu.memory_space<smem>>
    %c1 = arith.constant 1 : index
    %1 = memref.load %arg1[%c1] : memref<5xf32, #tpu.memory_space<smem>>
    %c2 = arith.constant 2 : index
    %2 = memref.load %arg1[%c2] : memref<5xf32, #tpu.memory_space<smem>>
    %c3 = arith.constant 3 : index
    %3 = memref.load %arg1[%c3] : memref<5xf32, #tpu.memory_space<smem>>
    %c4 = arith.constant 4 : index
    %4 = memref.load %arg1[%c4] : memref<5xf32, #tpu.memory_space<smem>>
    %5 = arith.sitofp %arg0 : i32 to f32
    %6 = arith.addf %0, %5 : f32
    %7 = arith.divf %6, %1 : f32
    %cst = arith.constant 1.000000e+00 : f32
    %8 = arith.subf %cst, %7 : f32
    %9 = arith.mulf %2, %8 : f32
    %10 = arith.mulf %3, %8 : f32
    %c0_i32 = arith.constant 0 : i32
    %11 = arith.cmpi eq, %arg0, %c0_i32 : i32
    %12 = arith.extui %11 : i1 to i32
    %c0_i32_0 = arith.constant 0 : i32
    %13 = arith.cmpi ne, %12, %c0_i32_0 : i32
    scf.if %13 {
      %c0_19 = arith.constant 0 : index
      %c0_20 = arith.constant 0 : index
      %76 = vector.load %arg3[%c0_19, %c0_20] : memref<32x128xf32, #tpu.memory_space<vmem>>, vector<32x128xf32>
      %c0_21 = arith.constant 0 : index
      %c0_22 = arith.constant 0 : index
      %77 = vector.load %arg5[%c0_21, %c0_22] : memref<32x128xf32, #tpu.memory_space<vmem>>, vector<32x128xf32>
      tpu.vector_store %arg5[%c0_21, %c0_22], %76 {strides = array<i32>} : memref<32x128xf32, #tpu.memory_space<vmem>>, vector<32x128xf32>,
    } else {
    }
    %c0_1 = arith.constant 0 : index
    %c0_2 = arith.constant 0 : index
    %14 = vector.load %arg5[%c0_1, %c0_2] : memref<32x128xf32, #tpu.memory_space<vmem>>, vector<32x128xf32>
    %c0_3 = arith.constant 0 : index
    %c0_4 = arith.constant 0 : index
    %c0_5 = arith.constant 0 : index
    %15 = vector.load %arg2[%c0_3, %c0_4, %c0_5] : memref<1x32x1xf32, #tpu.memory_space<vmem>>, vector<1x32x1xf32>
    %16 = vector.shape_cast %15 : vector<1x32x1xf32> to vector<32x1xf32>
    %c0_6 = arith.constant 0 : index
    %c0_7 = arith.constant 0 : index
    %17 = vector.load %arg4[%c0_6, %c0_7] : memref<2x128xf32, #tpu.memory_space<vmem>>, vector<2x128xf32>
    %18 = vector.broadcast %16 : vector<32x1xf32> to vector<32x128xf32>
    %19 = arith.subf %18, %14 : vector<32x128xf32>
    %20 = vector.broadcast %4 : f32 to vector<32x128xf32>
    %21 = arith.addf %19, %20 : vector<32x128xf32>
    %22 = arith.mulf %21, %21 : vector<32x128xf32>
    %cst_8 = arith.constant dense<0.000000e+00> : vector<128xf32>
    %23 = vector.multi_reduction <add>, %22, %cst_8 [0] : vector<32x128xf32> to vector<128xf32>
    %24 = vector.shape_cast %23 : vector<128xf32> to vector<1x128xf32>
    %25 = tpu.iota {dimensions = array<i32: 1>} : vector<1x128xi32>
    %26 = vector.shape_cast %24 : vector<1x128xf32> to vector<1x1x128xf32>
    %cst_9 = arith.constant dense<0x7F800000> : vector<1xf32>
    %27 = vector.multi_reduction <minimumf>, %26, %cst_9 [1, 2] : vector<1x1x128xf32> to vector<1xf32>
    %28 = vector.shape_cast %27 : vector<1xf32> to vector<1x1x1xf32>
    %29 = vector.extract %28[0, 0, 0] : f32 from vector<1x1x1xf32>
    %30 = vector.broadcast %29 : f32 to vector<1x128xf32>
    %31 = arith.cmpf oeq, %24, %30 : vector<1x128xf32>
    %c128_i32 = arith.constant 128 : i32
    %32 = vector.broadcast %c128_i32 : i32 to vector<1x128xi32>
    %33 = arith.select %31, %25, %32 : vector<1x128xi1>, vector<1x128xi32>
    %34 = vector.shape_cast %33 : vector<1x128xi32> to vector<1x1x128xi32>
    %cst_10 = arith.constant dense<2147483647> : vector<1xi32>
    %35 = vector.multi_reduction <minsi>, %34, %cst_10 [1, 2] : vector<1x1x128xi32> to vector<1xi32>
    %36 = vector.shape_cast %35 : vector<1xi32> to vector<1x1x1xi32>
    %37 = vector.extract %36[0, 0, 0] : i32 from vector<1x1x1xi32>
    %38 = vector.broadcast %37 : i32 to vector<1x128xi32>
    %39 = arith.cmpi eq, %25, %38 : vector<1x128xi32>
    %40 = vector.extract_strided_slice %17 {offsets = [0, 0], sizes = [1, 128], strides = [1, 1]} : vector<2x128xf32> to vector<1x128xf32>
    %cst_11 = arith.constant 0.000000e+00 : f32
    %41 = vector.broadcast %cst_11 : f32 to vector<1x128xf32>
    %42 = arith.select %39, %40, %41 : vector<1x128xi1>, vector<1x128xf32>
    %43 = vector.shape_cast %42 : vector<1x128xf32> to vector<1x1x128xf32>
    %cst_12 = arith.constant dense<0.000000e+00> : vector<1xf32>
    %44 = vector.multi_reduction <add>, %43, %cst_12 [1, 2] : vector<1x1x128xf32> to vector<1xf32>
    %45 = vector.shape_cast %44 : vector<1xf32> to vector<1x1x1xf32>
    %46 = vector.extract %45[0, 0, 0] : f32 from vector<1x1x1xf32>
    %47 = vector.extract_strided_slice %17 {offsets = [1, 0], sizes = [1, 128], strides = [1, 1]} : vector<2x128xf32> to vector<1x128xf32>
    %cst_13 = arith.constant 0.000000e+00 : f32
    %48 = vector.broadcast %cst_13 : f32 to vector<1x128xf32>
    %49 = arith.select %39, %47, %48 : vector<1x128xi1>, vector<1x128xf32>
    %50 = vector.shape_cast %49 : vector<1x128xf32> to vector<1x1x128xf32>
    %cst_14 = arith.constant dense<0.000000e+00> : vector<1xf32>
    %51 = vector.multi_reduction <add>, %50, %cst_14 [1, 2] : vector<1x1x128xf32> to vector<1xf32>
    %52 = vector.shape_cast %51 : vector<1xf32> to vector<1x1x1xf32>
    %53 = vector.extract %52[0, 0, 0] : f32 from vector<1x1x1xf32>
    %54 = vector.extract_strided_slice %17 {offsets = [0, 0], sizes = [1, 128], strides = [1, 1]} : vector<2x128xf32> to vector<1x128xf32>
    %55 = vector.broadcast %46 : f32 to vector<1x128xf32>
    %56 = arith.subf %54, %55 : vector<1x128xf32>
    %57 = vector.extract_strided_slice %17 {offsets = [1, 0], sizes = [1, 128], strides = [1, 1]} : vector<2x128xf32> to vector<1x128xf32>
    %58 = vector.broadcast %53 : f32 to vector<1x128xf32>
    %59 = arith.subf %57, %58 : vector<1x128xf32>
    %60 = arith.mulf %56, %56 : vector<1x128xf32>
    %61 = arith.mulf %59, %59 : vector<1x128xf32>
    %62 = arith.addf %60, %61 : vector<1x128xf32>
    %cst_15 = arith.constant 0.000000e+00 : f32
    %63 = vector.broadcast %cst_15 : f32 to vector<1x128xf32>
    %64 = arith.subf %63, %62 : vector<1x128xf32>
    %cst_16 = arith.constant 2.000000e+00 : f32
    %65 = arith.mulf %cst_16, %10 : f32
    %66 = arith.mulf %65, %10 : f32
    %67 = vector.broadcast %66 : f32 to vector<1x128xf32>
    %68 = arith.divf %64, %67 : vector<1x128xf32>
    %69 = math.exp %68 : vector<1x128xf32>
    %70 = vector.broadcast %9 : f32 to vector<1x128xf32>
    %71 = arith.mulf %70, %69 : vector<1x128xf32>
    %72 = vector.broadcast %71 : vector<1x128xf32> to vector<32x128xf32>
    %73 = arith.mulf %72, %19 : vector<32x128xf32>
    %74 = arith.addf %14, %73 : vector<32x128xf32>
    %c0_17 = arith.constant 0 : index
    %c0_18 = arith.constant 0 : index
    %75 = vector.load %arg5[%c0_17, %c0_18] : memref<32x128xf32, #tpu.memory_space<vmem>>, vector<32x128xf32>
    tpu.vector_store %arg5[%c0_17, %c0_18], %74 {strides = array<i32>} : memref<32x128xf32, #tpu.memory_space<vmem>>, vector<32x128xf32>,
    return
  }
  func.func @transform_0(%arg0: i32) -> i32 {
    %c0_i32 = arith.constant 0 : i32
    %c0_i32_0 = arith.constant 0 : i32
    return %c0_i32 : i32
  }
  func.func @transform_1(%arg0: i32) -> (i32, i32, i32) {
    %c0_i32 = arith.constant 0 : i32
    %c0_i32_0 = arith.constant 0 : i32
    %c0_i32_1 = arith.constant 0 : i32
    return %arg0, %c0_i32, %c0_i32_0 : i32, i32, i32
  }
  func.func @transform_2(%arg0: i32) -> (i32, i32) {
    %c0_i32 = arith.constant 0 : i32
    %c0_i32_0 = arith.constant 0 : i32
    %c0_i32_1 = arith.constant 0 : i32
    return %c0_i32, %c0_i32_0 : i32, i32
  }
  func.func @transform_3(%arg0: i32) -> (i32, i32) {
    %c0_i32 = arith.constant 0 : i32
    %c0_i32_0 = arith.constant 0 : i32
    %c0_i32_1 = arith.constant 0 : i32
    return %c0_i32, %c0_i32_0 : i32, i32
  }
  func.func @transform_4(%arg0: i32) -> (i32, i32) {
    %c0_i32 = arith.constant 0 : i32
    %c0_i32_0 = arith.constant 0 : i32
    %c0_i32_1 = arith.constant 0 : i32
    return %c0_i32, %c0_i32_0 : i32, i32
  }
}

</mosaic_0001>

<bundles_post_ra>
// kernel: tpu_custom_call.1
= control target key start
LH: loop header
LB: loop body
LE: loop exit
PB: predicated region body
PF: predicated region fallthrough
CT: control target
= control target key end

     0   :  { %9 = vsyncpa [#allocation5], 0  ;;  %s774_s0 = inlined_call_operand.vmem [shape: f32[5], index: 0, kind: input, shape index: {}]   ;;  %s775_s1 = inlined_call_operand.vmem [shape: f32[32,32,1], index: 1, kind: input, shape index: {}]   ;;  %s776_s2 = inlined_call_operand.hbm [shape: f32[32,128], index: 2, kind: input, shape index: {}, may-alias: {2,4}]   ;;  %s777_s3 = inlined_call_operand.vmem [shape: f32[2,128], index: 3, kind: input, shape index: {}]   ;;  %s778_s4 = inlined_call_operand.hbm [shape: f32[32,128], index: 4, kind: output, shape index: {}, may-alias: {2,4}]  }
   0x1   :  { %10 = vsyncpa [#allocation3], 0 }
   0x2   :  { %11 = vsyncpa [#allocation4], 0  ;;  %s645_s15 = smov 0  }
   0x3 LB: > { %s651_s16 = sadd.s32 4294967295, %s610_s15   ;;  %p449_p0 = scmp.ge.s32.totalorder %s610_s15, 1  ;;  %s610_s15 = sphi %s645_s15, %s17_s15  }
   0x4   : > { %p132_p1 = scmp.lt.s32.totalorder %s610_s15, 33  ;;  %p779_p3 = scmp.eq.s32.totalorder %s651_s16, 0 }
   0x5   : > { %s145_s19 = sshll.u32 %s774_s0, 4  ;;  %s612_s21 = smov [#allocation6]   ;;  %s146_s19 = int_to_ptr.vmem [resolvable:$true] %s145_s19 }
   0x6   : > { %p660_p4 = pnand %p449_p0, %p132_p1  ;;  %s155_s22 = sshll.u32 %s612_s21, 4  ;;  %s156_s22 = int_to_ptr.vmem [resolvable:$true] %s155_s22 }
   0x7   : > { %s527_s24 = scalar_lea.vmem %s146_s19, 16  ;;  %p535_p11 = scmp.lt.s32.totalorder %s146_s19, %s146_s19 }
   0x8   : > { %s781_s20 = scalar_select %p660_p4, 1, 0 }
   0x9   : > { %p490_p5 = pneg %p660_p4  ;;  %p528_p7 = scmp.ne.s32.totalorder %s146_s19, %s527_s24 }
   0xa   : > { %p536_p12 = scmp.lt.s32.totalorder %s527_s24, %s527_s24 }
   0xb   : > { %p668_p6 = pnand %p779_p3, %p490_p5 }
   0xc   : > { %p537_p13 = por %p536_p12, %p535_p11 }
   0xd   : > { %p529_p8 = pneg %p668_p6 }
   0xf   : > { %p530_p9 = pnand %p529_p8, %p528_p7 }
  0x11   : > { %p531_p10 = pneg %p530_p9 }
  0x13   : > { %p538_p0 = pnand %p537_p13, %p531_p10 }
  0x15   : > { %541 = shalt.err (!%p538_p0)
}
  0x16   : > { %s613_s25 = smov [#allocation2]   ;;  %s553_s26 = scalar_lea.vmem %s156_s22, 512 }
  0x17   : > { %493 = dma.vmem_to_smem (!%p668_p6), %s146_s19, 16, %s613_s25, [#allocation5]  }
  0x18   : > { %p554_p1 = scmp.ne.s32.totalorder %s156_s22, %s553_s26  ;;  %p561_p3 = scmp.lt.s32.totalorder %s156_s22, %s156_s22 }
  0x19   : > { %p562_p4 = scmp.lt.s32.totalorder %s553_s26, %s553_s26 }
  0x1a   : > { %p556_p5 = pnand %p554_p1, %p529_p8 }
  0x1b   : > { %p563_p7 = por %p562_p4, %p561_p3 }
  0x1c   : > { %p557_p2 = pneg %p556_p5 }
  0x1e   : > { %p564_p9 = pnand %p563_p7, %p557_p2 }
  0x20   : > { %567 = shalt.err (!%p564_p9)
}
  0x21   : > { %s614_s27 = smov 128   ;;  %s615_s28 = smov 8  }
  0x22   : > { %496 = dma.hbm_to_vmem [thread:$0]  (!%p668_p6), %s776_s2, 512, %s156_s22, [#allocation3], %s614_s27, %s614_s27, %s615_s28  }
  0x23   : > { %p783_p10 = scmp.ne.s32.totalorder %s781_s20, 0 }
  0x24   : > { %p784_p11 = scmp.eq.s32.totalorder (!%p783_p10), %s651_s16, 0 }
  0x25   : > { %182 = sbr.rel (%p783_p10) target bundleno = 1061 (0x425), region = 36 }
  0x2a   : > { %597 = dma.done.wait (%p784_p11), [#allocation5], 16   ;;  %p785_p8 = pmov %p784_p11 }
  0x2c   : > { %599 = vsyncadd (%p785_p8), [#allocation5], 4294967280  ;;  %p786_p2 = pmov %p785_p8 }
  0x2e   : > { %601 = dma.done.wait (%p786_p2), [#allocation3], 512   ;;  %p787_p3 = pmov %p786_p2 }
  0x30   : > { %603 = vsyncadd (%p787_p3), [#allocation3], 4294966784 }
  0x31   : > { %192 = sfence }
  0x32   : > { %p208_p4 = scmp.lt.s32.totalorder %s651_s16, 31  ;;  %s458_s5 = sld [smem:[#allocation2 + $0x1]] }
  0x33   : > { %s692_s6 = sld [smem:[#allocation2 + $0x4]]  ;;  %s218_s13 = scvt.s32.f32 %s651_s16 }
  0x34   : > { %s209_s7 = scalar_select %p208_p4, %s651_s16, 31 }
  0x35   : > { %s213_s12 = sld [smem:[#allocation2]]  ;;  %p788_p6 = scmp.ne.s32.totalorder %s651_s16, 0 }
  0x36   : > { %s467_s8 = sshll.u32 %s209_s7, 5  ;;  %s701_s14 = sld [smem:[#allocation2 + $0x2]] }
  0x37   : > { %s698_s11 = scalar_lea.vmem %s775_s1, %s467_s8  ;;  %s460_s18 = sld [smem:[#allocation2 + $0x3]] }
  0x38   : > { %v220_v0 = vstv %s458_s5 }
  0x39   : > { %519 = vrcp.f32 %v220_v0 }
  0x3b   : > { %s219_s17 = sadd.f32 %s218_s13, %s213_s12 }
  0x46   : > { %v520_v1 = vpop.eup %519 }
  0x47   : > { %468 = vpush %v520_v1 }
  0x78   : > { %s469_s19 = spop %468 }
  0x79   : > { %s223_s20 = smul.f32 %s469_s19, %s219_s17 }
  0x7a   : > { %230 = sbr.rel (%p788_p6) target bundleno = 130 (0x82), region = 48 }
  0x7b   : > { %s703_s21 = ssub.f32 1.0, %s223_s20 }
  0x7d   : > { %s225_s22 = smul.f32 %s701_s14, %s703_s21 }
  0x7e   : > { %s708_s23 = smul.f32 %s460_s18, %s703_s21 }
  0x7f   : > { %v231_v2 = vld [vmem:[#allocation6] sm:$0xff]  ;;  %v232_v3 = vld [vmem:[#allocation6 + $0x8] sm:$0xff]  ;;  %v233_v4 = vld [vmem:[#allocation6 + $0x10] sm:$0xff] }
  0x80   : > { %235 = vst [vmem:[#allocation7] sm:$0xff] %v231_v2  ;;  %236 = vst [vmem:[#allocation7 + $0x8] sm:$0xff] %v232_v3  ;;  %v234_v5 = vld [vmem:[#allocation6 + $0x18] sm:$0xff] }
  0x81   : > { %237 = vst [vmem:[#allocation7 + $0x10] sm:$0xff] %v233_v4  ;;  %238 = vst [vmem:[#allocation7 + $0x18] sm:$0xff] %v234_v5 }
  0x82 PF: > { %v245_v6 = vld [vmem:[%s698_s11 + $0x10] sm:$0xff]  ;;  %v243_v7 = vld [vmem:[%s698_s11] sm:$0xff]  ;;  %v616_v8 = vmov 0   ;;  %v246_v9 = vld [vmem:[%s698_s11 + $0x18] sm:$0xff]  ;;  %v272_v16 = vstv %s692_s6  ;;  %v290_v42 = vlaneseq  ;;  %vm316_vm2 = vcmask 1040384   ;;  %s351_s28 = smul.f32 2.0, %s708_s23 }
  0x83   : > { %522 = vset.pattern.permute.xlu1 %v616_v8  ;;  %521 = vset.pattern.permute.xlu0 %v616_v8  ;;  %v244_v10 = vld [vmem:[%s698_s11 + $0x8] sm:$0xff]  ;;  %v247_v57 = vld [vmem:[%s777_s3] sm:$0x3]  ;;  %s617_s6 = smov [#allocation7]   ;;  %p501_p12 = scmp.eq.s32.totalorder %s651_s16, 31 }
  0x84   : > { %260 = vperm.xlu1 %522, %v245_v6   ;;  %250 = vperm.xlu0 %521, %v243_v7   ;;  %v291_v43 = vand.u32 127, %v290_v42  ;;  %s352_s29 = smul.f32 %s351_s28, %s708_s23  ;;  %s382_s7 = sshll.u32 %s617_s6, 4  ;;  %s383_s7 = int_to_ptr.vmem [resolvable:$true] %s382_s7 }
  0x85   : > { %s568_s8 = scalar_lea.vmem %s383_s7, 512  ;;  %p575_p5 = scmp.lt.s32.totalorder %s383_s7, %s383_s7 }
  0x86   : > { %p569_p13 = scmp.ne.s32.totalorder %s383_s7, %s568_s8  ;;  %p576_p7 = scmp.lt.s32.totalorder %s568_s8, %s568_s8 }
  0x87   : > { %v716_v11 = vld [vmem:[#allocation7] sm:$0xff]  ;;  %v726_v18 = vld [vmem:[#allocation7 + $0x8] sm:$0xff] }
  0x88   : > { %265 = vperm.xlu1 %522, %v246_v9   ;;  %255 = vperm.xlu0 %521, %v244_v10   ;;  %v718_v13 = vld [vmem:[#allocation7 + $0x10] sm:$0xff]  ;;  %v724_v17 = vld [vmem:[#allocation7 + $0x18] sm:$0xff]  ;;  %p570_p0 = pnand %p569_p13, %p501_p12  ;;  %p577_p9 = por %p576_p7, %p575_p5 }
  0x8a   : > { %p571_p1 = pneg %p570_p0 }
  0x8c   : > { %p578_p10 = pnand %p577_p9, %p571_p1 }
  0xff   : > { %v261_v12 = vpop.permute.xlu1 %260  ;;  %v251_v14 = vpop.permute.xlu0 %250 }
 0x100   : > { %v721_v15 = vsub.f32 %v251_v14, %v716_v11  ;;  %v729_v19 = vsub.f32 %v261_v12, %v718_v13 }
 0x102   : > { %v273_v22 = vadd.f32 %v272_v16, %v721_v15  ;;  %v275_v25 = vadd.f32 %v272_v16, %v729_v19 }
 0x103   : > { %v266_v20 = vpop.permute.xlu1 %265  ;;  %v256_v21 = vpop.permute.xlu0 %255 }
 0x104   : > { %v733_v23 = vsub.f32 %v266_v20, %v724_v17  ;;  %v736_v24 = vsub.f32 %v256_v21, %v726_v18  ;;  %v277_v27 = vmul.f32 %v273_v22, %v273_v22  ;;  %v279_v30 = vmul.f32 %v275_v25, %v275_v25 }
 0x106   : > { %v274_v26 = vadd.f32 %v272_v16, %v736_v24  ;;  %v276_v28 = vadd.f32 %v272_v16, %v733_v23  ;;  %v353_v16 = vstv %s352_s29 }
 0x107   : > { %523 = vrcp.f32 %v353_v16 }
 0x108   : > { %v278_v29 = vmul.f32 %v274_v26, %v274_v26  ;;  %v280_v32 = vmul.f32 %v276_v28, %v276_v28 }
 0x10a   : > { %v281_v31 = vadd.f32 %v278_v29, %v277_v27 }
 0x10c   : > { %v282_v33 = vadd.f32 %v281_v31, %v279_v30 }
 0x10e   : > { %v283_v34 = vadd.f32 %v282_v33, %v280_v32 }
 0x110   : > { %v284_v35 = vrot.slane %v283_v34, 4 }
 0x112   : > { %v285_v36 = vadd.f32 %v284_v35, %v283_v34  ;;  %v361_v34 = vshrl.u32 %v290_v42, 7  ;;  %v358_v35 = vstv %s225_s22 }
 0x114   : > { %v286_v37 = vrot.slane %v285_v36, 2  ;;  %v524_v30 = vpop.eup %523 }
 0x116   : > { %v287_v38 = vadd.f32 %v286_v37, %v285_v36  ;;  %v362_v36 = vsub.s32 0, %v361_v34 }
 0x118   : > { %v288_v39 = vrot.slane %v287_v38, 1 }
 0x11a   : > { %v289_v40 = vadd.f32 %v288_v39, %v287_v38 }
 0x11c   : > { %292 = vmin.xlane.f32.xlu0 %v289_v40 }
 0x1a5   : > { %v293_v41 = vpop.xlane.xlu0 %292 }
 0x1a6   : > { %470 = vpush %v293_v41 }
 0x1d7   : > { %s471_s24 = spop %470 }
 0x1d8   : > { %v295_v44 = vstv %s471_s24 }
 0x1d9   : > { %vm296_vm0 = vcmp.eq.f32.partialorder %v289_v40, %v295_v44 }
 0x1da   : > { %v297_v45 = vsel %vm296_vm0, %v291_v43, 128 }
 0x1db   : > { %v299_v46 = vshra.s32 %v297_v45, 16  ;;  %v298_v48 = vand.u32 65535, %v297_v45 }
 0x1dd   : > { %v301_v47 = vcvt.s32.f32 %v299_v46  ;;  %v300_v50 = vcvt.s32.f32 %v298_v48 }
 0x1df   : > { %302 = vmin.xlane.f32.xlu1 %v301_v47 }
 0x268   : > { %v303_v49 = vpop.xlane.xlu1 %302 }
 0x269   : > { %vm304_vm1 = vcmp.eq.f32.partialorder %v301_v47, %v303_v49  ;;  %v309_v52 = vcvt.f32.s32 %v303_v49 }
 0x26a   : > { %v305_v51 = vsel %vm304_vm1, %v300_v50, inf }
 0x26b   : > { %306 = vmin.xlane.f32.xlu0 %v305_v51  ;;  %v310_v54 = vshll.u32 %v309_v52, 16 }
 0x2f4   : > { %v307_v53 = vpop.xlane.xlu0 %306 }
 0x2f5   : > { %v308_v55 = vcvt.f32.s32 %v307_v53 }
 0x2f7   : > { %v311_v56 = vadd.s32 %v310_v54, %v308_v55 }
 0x2f9   : > { %472 = vpush %v311_v56 }
 0x32a   : > { %s473_s25 = spop %472 }
 0x32b   : > { %v313_v58 = vstv %s473_s25 }
 0x32c   : > { %vm314_vm3 = vcmp.eq.s32.totalorder %v291_v43, %v313_v58 }
 0x32d   : > { %v315_v59 = vsel %vm314_vm3, %v247_v57, 0.0 }
 0x32e   : > { %v317_v60 = vsel %vm316_vm2, %v315_v59, 0.0  ;;  %v328_v61 = vrot.slane %v315_v59, 1 }
 0x32f   : > { %318 = vadd.xlane.f32.xlu0 %v317_v60 }
 0x330   : > { %v330_v62 = vsel %vm316_vm2, %v328_v61, 0.0 }
 0x331   : > { %331 = vadd.xlane.f32.xlu1 %v330_v62 }
 0x3b8   : > { %v319_v63 = vpop.xlane.xlu0 %318 }
 0x3b9   : > { %v320_v0 = vrot.slane %v319_v63, 4 }
 0x3ba   : > { %v332_v1 = vpop.xlane.xlu1 %331 }
 0x3bb   : > { %v321_v2 = vadd.f32 %v320_v0, %v319_v63  ;;  %v333_v3 = vrot.slane %v332_v1, 4 }
 0x3bd   : > { %v322_v4 = vrot.slane %v321_v2, 2  ;;  %v334_v5 = vadd.f32 %v333_v3, %v332_v1 }
 0x3bf   : > { %v323_v6 = vadd.f32 %v322_v4, %v321_v2  ;;  %v335_v7 = vrot.slane %v334_v5, 2 }
 0x3c1   : > { %v336_v8 = vadd.f32 %v335_v7, %v334_v5  ;;  %v324_v9 = vrot.slane %v323_v6, 1 }
 0x3c3   : > { %v325_v10 = vadd.f32 %v324_v9, %v323_v6  ;;  %v337_v12 = vrot.slane %v336_v8, 1 }
 0x3c5   : > { %474 = vpush %v325_v10  ;;  %v338_v14 = vadd.f32 %v337_v12, %v336_v8 }
 0x3c7   : > { %476 = vpush %v338_v14 }
 0x3f6   : > { %s475_s30 = spop %474 }
 0x3f7   : > { %v340_v20 = vstv %s475_s30 }
 0x3f8   : > { %s477_s5 = spop %476  ;;  %v341_v22 = vsub.f32 %v247_v57, %v340_v20 }
 0x3f9   : > { %v342_v21 = vstv %s477_s5 }
 0x3fa   : > { %v343_v25 = vsub.f32 %v247_v57, %v342_v21  ;;  %v344_v27 = vmul.f32 %v341_v22, %v341_v22 }
 0x3fc   : > { %v345_v26 = vmul.f32 %v343_v25, %v343_v25 }
 0x3fe   : > { %v347_v28 = vrot.slane %v345_v26, 1 }
 0x400   : > { %v349_v29 = vadd.f32 %v347_v28, %v344_v27 }
 0x402   : > { %v350_v31 = vsub.f32 0.0, %v349_v29 }
 0x404   : > { %v355_v32 = vmul.f32 %v524_v30, %v350_v31 }
 0x406   : > { %v356_v33 = vmul.f32 1.442695, %v355_v32 }
 0x408   : > { %525 = vpow2.f32 %v356_v33 }
 0x415   : > { %v526_v37 = vpop.eup %525 }
 0x416   : > { %v359_v38 = vmul.f32 %v526_v37, %v358_v35 }
 0x418   : > { %v363_v39 = vrot.slane %v359_v38, %v362_v36 }
 0x41a   : > { %v364_v40 = vmul.f32 %v363_v39, %v721_v15  ;;  %v365_v41 = vmul.f32 %v363_v39, %v736_v24  ;;  %v366_v43 = vmul.f32 %v363_v39, %v729_v19  ;;  %v367_v44 = vmul.f32 %v363_v39, %v733_v23 }
 0x41c   : > { %v368_v42 = vadd.f32 %v364_v40, %v716_v11  ;;  %v369_v45 = vadd.f32 %v365_v41, %v726_v18  ;;  %v370_v46 = vadd.f32 %v366_v43, %v718_v13  ;;  %v371_v47 = vadd.f32 %v367_v44, %v724_v17 }
 0x41e   : > { %372 = vst [vmem:[#allocation7] sm:$0xff] %v368_v42  ;;  %373 = vst [vmem:[#allocation7 + $0x8] sm:$0xff] %v369_v45 }
 0x41f   : > { %374 = vst [vmem:[#allocation7 + $0x10] sm:$0xff] %v370_v46  ;;  %375 = vst [vmem:[#allocation7 + $0x18] sm:$0xff] %v371_v47 }
 0x420   : > { %581 = shalt.err (!%p578_p10)
}
 0x421   : > { %s618_s9 = smov 128   ;;  %s619_s10 = smov 8  }
 0x422   : > { %487 = dma.vmem_to_hbm [thread:$0]  (%p501_p12), %s383_s7, 512, %s778_s4, [#allocation4], %s618_s9, %s618_s9, %s619_s10  }
 0x423   : > { %605 = dma.done.wait (%p501_p12), [#allocation4], 512  }
 0x424   : > { %607 = vsyncadd (%p501_p12), [#allocation4], 4294966784 }
 0x425 PF: > { %s17_s15 = sadd.s32 1, %s610_s15  }
 0x426   : > { %p14_p11 = scmp.ge.s32.totalorder %s17_s15, 34  }
 0x428   :  { %16 = sbr.rel (!%p14_p11) target bundleno = 3 (0x3), region = 77 }
 0x42d   :  { %398 = vsyncpa [#allocation3], 1 }
 0x42e   :  { %400 = vsyncpa [#allocation3 + $0x1], 1 }
 0x42f   :  { %401 = vsyncpa [#allocation4], 1 }
 0x430   :  { %403 = vsyncpa [#allocation4 + $0x1], 1 }
 0x431   :  { %404 = vsyncpa [#allocation5], 1 }
 0x432   :  { %406 = vsyncpa [#allocation5 + $0x1], 1 }

</bundles_post_ra>
